<compile_context>
chip_gen: v7x
topology: tpu7x:2x2x1
jax: 0.10.0
libtpu: 0.0.40
codegen_flags: <defaults>
</compile_context>

<pallas_src>
import jax
import jax.numpy as jnp
from jax.experimental import pallas as pl
from jax.experimental.pallas import tpu as pltpu


def _token_embedding_kernel(x_ref, w_ref, o_ref):
    """x_ref: (TB, L, C) f32, w_ref: (3C, H) compute-dtype, o_ref: (TB, L, H)."""
    x = x_ref[...]                                   # (TB, L, C), f32 in VMEM
    tb, l, c = x.shape

    # Per-sequence circular taps: L is the full (untiled) sequence axis of each
    # segment, so a static roll along axis=1 is exactly the circular padding.
    x_prev = jnp.roll(x, 1, axis=1)                  # x[t-1 mod L]
    x_next = jnp.roll(x, -1, axis=1)                 # x[t+1 mod L]

    # Fuse the three K=C dots into one K=3C dot: one MXU weight push, one pass.
    x_cat = jnp.concatenate([x_prev, x, x_next], axis=2)      # (TB, L, 3C)
    x_cat = x_cat.reshape(tb * l, 3 * c).astype(w_ref.dtype)  # cast at the MXU

    acc = jnp.dot(x_cat, w_ref[...], preferred_element_type=jnp.float32)
    o_ref[...] = acc.reshape(tb, l, -1).astype(o_ref.dtype)


def _vmem_caps():
    """(physical VMEM bytes, scoped limit to request)."""
    try:
        cap = int(pltpu.get_tpu_info().vmem_capacity_bytes)
    except Exception:
        cap = 64 * 1024 * 1024          # conservative fallback (v7x per-core VMEM)
    scoped = min(cap // 2, 64 * 1024 * 1024)   # 32 MiB on v7x, 64 MiB on v5e/v6e
    return cap, scoped


def _tile_footprint_bytes(rows, c_in, hidden, out_bytes):
    """Double-buffered VMEM footprint of one grid step."""
    in_db = 2 * rows * c_in * 4                      # f32 input tiles (x2 buffers)
    out_db = 2 * rows * hidden * out_bytes           # output tiles (x2 buffers)
    w = 3 * c_in * hidden * 2                        # bf16 weights (resident)
    interm = rows * (3 * c_in * (4 + 2) + hidden * 4)  # x_cat f32+bf16, f32 acc
    return in_db + out_db + w + interm


def _pick_block_batches(B, L, C, H, out_bytes, tile_budget):
    """How many sequences to fold into one (TB, L, C) row tile."""
    divisors = [tb for tb in range(1, B + 1) if B % tb == 0]
    fitting = [tb for tb in divisors
               if _tile_footprint_bytes(tb * L, C, H, out_bytes) <= tile_budget]
    if not fitting:
        fitting = [1]

    def score(tb):
        rows = tb * L
        steps = B // tb
        return (steps >= 4,          # >=2 grid steps per TensorCore on v7x
                steps >= 2,          # keep the BlockSpec pipeline alive
                rows % 8 == 0,       # 8-aligned rows -> free in-kernel reshapes
                min(rows, 8192),     # big tiles amortize ~0.35us per-step cost
                -rows)               # beyond that, prefer more steps

    return max(fitting, key=score)


def token_embedding(x, weight, *, block_batches=None,
                    out_dtype=jnp.bfloat16, compute_dtype=jnp.bfloat16):
    """Circular Conv1d (kernel_size=3, no bias), channels-last, via Pallas.

    x:      (B, L, C_in)  -- what TokenEmbedding.forward receives (pre-permute).
    weight: (H, C_in, 3)  -- PyTorch nn.Conv1d weight layout.
    Returns (B, L, H)  ==  tokenConv(x.permute(0,2,1)).transpose(1,2).

    Precision: the MXU multiply runs in `compute_dtype` (bf16 by default) with
    f32 accumulation; the output is stored as `out_dtype` (bf16 by default).
    Pass compute_dtype=out_dtype=jnp.float32 for PyTorch-matching numerics.
    """
    B, L, C = x.shape
    H, Cw, K = weight.shape
    assert Cw == C and K == 3

    out_bytes = jnp.dtype(out_dtype).itemsize
    cap, scoped = _vmem_caps()
    tile_budget = (scoped * 3) // 4

    if block_batches is None:
        block_batches = _pick_block_batches(B, L, C, H, out_bytes, tile_budget)
    TB = block_batches
    assert B % TB == 0

    footprint = _tile_footprint_bytes(TB * L, C, H, out_bytes)
    vmem_limit = min(cap, max(scoped, footprint + (4 << 20)))

    x = x.astype(jnp.float32)          # stays f32 in HBM; cast happens in-kernel
    # w_cat[k*C + c, h] = weight[h, c, k]  (tiny array; wrapper cast is free)
    w_cat = jnp.transpose(weight, (2, 1, 0)).reshape(3 * C, H).astype(compute_dtype)

    out = pl.pallas_call(
        _token_embedding_kernel,
        out_shape=jax.ShapeDtypeStruct((B, L, H), out_dtype),
        grid_spec=pltpu.PrefetchScalarGridSpec(
            num_scalar_prefetch=0,
            grid=(B // TB,),
            in_specs=[
                pl.BlockSpec((TB, L, C), lambda i: (i, 0, 0)),
                pl.BlockSpec((3 * C, H), lambda i: (0, 0)),
            ],
            out_specs=pl.BlockSpec((TB, L, H), lambda i: (i, 0, 0)),
        ),
        compiler_params=pltpu.CompilerParams(
            dimension_semantics=("parallel",),
            vmem_limit_bytes=int(vmem_limit)),
    )(x, w_cat)

    return out


def _reference(x, weight):
    """Pure-JAX reference of the circular Conv1d, on bf16-rounded inputs."""
    xr = x.astype(jnp.bfloat16).astype(jnp.float32)
    wr = weight.astype(jnp.bfloat16).astype(jnp.float32)
    x_prev = jnp.roll(xr, 1, axis=1)
    x_next = jnp.roll(xr, -1, axis=1)
    return (jnp.einsum("blc,hc->blh", x_prev, wr[:, :, 0], precision="highest")
            + jnp.einsum("blc,hc->blh", xr, wr[:, :, 1], precision="highest")
            + jnp.einsum("blc,hc->blh", x_next, wr[:, :, 2], precision="highest"))


if __name__ == "__main__":
    # Shapes consistent with the module's value_embedding (TokenEmbedding):
    # c_in=8 (module default), seq=8, hidden=128 (lane-dense output lane dim).
    HIDDEN, KSZ = 128, 3
    B, L, C_IN = 2, 8, 8
    key = jax.random.PRNGKey(0)
    kx, kw = jax.random.split(key)
    x = jax.random.normal(kx, (B, L, C_IN), dtype=jnp.float32)
    bound = (1.0 / (C_IN * KSZ)) ** 0.5
    weight = jax.random.uniform(kw, (HIDDEN, C_IN, KSZ), dtype=jnp.float32,
                                minval=-bound, maxval=bound)

    # Case 1: defaults (bf16 output, auto block picker -> 2 parallel grid steps).
    out = jax.block_until_ready(token_embedding(x, weight))
    ref = _reference(x, weight)
    assert out.shape == (B, L, HIDDEN) and out.dtype == jnp.bfloat16
    assert jnp.allclose(out.astype(jnp.float32), ref, atol=1e-2, rtol=1e-2), \
        float(jnp.max(jnp.abs(out.astype(jnp.float32) - ref)))

    # Case 2: f32 output, 2 sequences folded per block (exercises the TB>1
    # per-segment circular rolls inside one tile).
    B2 = 4
    kx2, kw2 = jax.random.split(jax.random.PRNGKey(1))
    x2 = jax.random.normal(kx2, (B2, L, C_IN), dtype=jnp.float32)
    w2 = jax.random.uniform(kw2, (HIDDEN, C_IN, KSZ), dtype=jnp.float32,
                            minval=-bound, maxval=bound)
    out2 = jax.block_until_ready(
        token_embedding(x2, w2, block_batches=2, out_dtype=jnp.float32))
    ref2 = _reference(x2, w2)
    assert out2.shape == (B2, L, HIDDEN) and out2.dtype == jnp.float32
    assert jnp.allclose(out2, ref2, atol=2e-3, rtol=2e-3), \
        float(jnp.max(jnp.abs(out2 - ref2)))

    print("KERNEL_OK")
</pallas_src>

<mosaic_0001>
module attributes {stable_mosaic.version = 11 : i64} {
  func.func @_token_embedding_kernel(%arg0: i32, %arg1: memref<1x8x8xf32, #tpu.memory_space<vmem>>, %arg2: memref<24x128xbf16, #tpu.memory_space<vmem>>, %arg3: memref<1x8x128xbf16, #tpu.memory_space<vmem>>) attributes {dimension_semantics = [#tpu.dimension_semantics<parallel>], iteration_bounds = array<i64: 2>, scalar_prefetch = 0 : i64, scratch_operands = 0 : i64, tpu.core_type = #tpu.core_type<tc>, window_params = [{transform_indices = @transform_0, window_bounds = array<i64: 1, 8, 8>}, {pipeline_mode = #tpu.pipeline_mode<synchronous>, transform_indices = @transform_1, window_bounds = array<i64: 24, 128>}, {transform_indices = @transform_2, window_bounds = array<i64: 1, 8, 128>}]} {
    %c0 = arith.constant 0 : index
    %c0_0 = arith.constant 0 : index
    %c0_1 = arith.constant 0 : index
    %0 = vector.load %arg1[%c0, %c0_0, %c0_1] : memref<1x8x8xf32, #tpu.memory_space<vmem>>, vector<1x8x8xf32>
    %1 = vector.extract_strided_slice %0 {offsets = [0, 7, 0], sizes = [1, 1, 8], strides = [1, 1, 1]} : vector<1x8x8xf32> to vector<1x1x8xf32>
    %2 = vector.extract_strided_slice %0 {offsets = [0, 0, 0], sizes = [1, 7, 8], strides = [1, 1, 1]} : vector<1x8x8xf32> to vector<1x7x8xf32>
    %3 = tpu.concatenate %1, %2 in 1 : vector<1x1x8xf32>, vector<1x7x8xf32> -> vector<1x8x8xf32>
    %4 = vector.extract_strided_slice %0 {offsets = [0, 1, 0], sizes = [1, 7, 8], strides = [1, 1, 1]} : vector<1x8x8xf32> to vector<1x7x8xf32>
    %5 = vector.extract_strided_slice %0 {offsets = [0, 0, 0], sizes = [1, 1, 8], strides = [1, 1, 1]} : vector<1x8x8xf32> to vector<1x1x8xf32>
    %6 = tpu.concatenate %4, %5 in 1 : vector<1x7x8xf32>, vector<1x1x8xf32> -> vector<1x8x8xf32>
    %7 = tpu.concatenate %3, %0, %6 in 2 : vector<1x8x8xf32>, vector<1x8x8xf32>, vector<1x8x8xf32> -> vector<1x8x24xf32>
    %8 = vector.shape_cast %7 : vector<1x8x24xf32> to vector<8x24xf32>
    %9 = arith.truncf %8 : vector<8x24xf32> to vector<8x24xbf16>
    %c0_2 = arith.constant 0 : index
    %c0_3 = arith.constant 0 : index
    %10 = vector.load %arg2[%c0_2, %c0_3] : memref<24x128xbf16, #tpu.memory_space<vmem>>, vector<24x128xbf16>
    %cst = arith.constant dense<0.000000e+00> : vector<8x128xf32>
    %11 = tpu.matmul %9, %10, %cst {dimension_numbers = #tpu.dot_dimension_numbers<[1], [0], [0], [1], [0, 0, 1, 1], [], []>} : vector<8x24xbf16>, vector<24x128xbf16>, vector<8x128xf32> -> vector<8x128xf32>
    %12 = vector.shape_cast %11 : vector<8x128xf32> to vector<1x8x128xf32>
    %13 = arith.truncf %12 : vector<1x8x128xf32> to vector<1x8x128xbf16>
    %c0_4 = arith.constant 0 : index
    %c0_5 = arith.constant 0 : index
    %c0_6 = arith.constant 0 : index
    %14 = vector.load %arg3[%c0_4, %c0_5, %c0_6] : memref<1x8x128xbf16, #tpu.memory_space<vmem>>, vector<1x8x128xbf16>
    tpu.vector_store %arg3[%c0_4, %c0_5, %c0_6], %13 {strides = array<i32>} : memref<1x8x128xbf16, #tpu.memory_space<vmem>>, vector<1x8x128xbf16>,
    return
  }
  func.func @transform_0(%arg0: i32) -> (i32, i32, i32) {
    %c0_i32 = arith.constant 0 : i32
    %c0_i32_0 = arith.constant 0 : i32
    %c0_i32_1 = arith.constant 0 : i32
    return %arg0, %c0_i32, %c0_i32_0 : i32, i32, i32
  }
  func.func @transform_1(%arg0: i32) -> (i32, i32) {
    %c0_i32 = arith.constant 0 : i32
    %c0_i32_0 = arith.constant 0 : i32
    %c0_i32_1 = arith.constant 0 : i32
    return %c0_i32, %c0_i32_0 : i32, i32
  }
  func.func @transform_2(%arg0: i32) -> (i32, i32, i32) {
    %c0_i32 = arith.constant 0 : i32
    %c0_i32_0 = arith.constant 0 : i32
    %c0_i32_1 = arith.constant 0 : i32
    return %arg0, %c0_i32, %c0_i32_0 : i32, i32, i32
  }
}

</mosaic_0001>

<bundles_post_ra>
// kernel: tpu_custom_call.1
= control target key start
LH: loop header
LB: loop body
LE: loop exit
PB: predicated region body
PF: predicated region fallthrough
CT: control target
= control target key end

     0   :  { %7 = vsyncpa [#allocation3], 0  ;;  %s797_s0 = inlined_call_operand.hbm [shape: f32[2,8,8], index: 0, kind: input, shape index: {}]   ;;  %s798_s1 = inlined_call_operand.hbm [shape: bf16[24,128], index: 1, kind: input, shape index: {}]   ;;  %s799_s2 = inlined_call_operand.hbm [shape: bf16[2,8,128], index: 2, kind: output, shape index: {}]  }
   0x1   :  { %9 = vsyncpa [#allocation3 + $0x1], 0 }
   0x2   :  { %10 = vsyncpa [#allocation6], 0 }
   0x3   :  { %11 = vsyncpa [#allocation4], 0 }
   0x4   :  { %13 = vsyncpa [#allocation4 + $0x1], 0  ;;  %s600_s9 = smov 0   ;;  %s602_s10 = smov 0  }
   0x5   :  { %s604_s11 = smov 0   ;;  %s606_s12 = smov 0  }
   0x6 LB: > { %s621_s13 = sadd.s32 4294967295, %s574_s12   ;;  %s353_s14 = sadd.s32 4294967294, %s574_s12   ;;  %s574_s12 = sphi %s606_s12, %s819_s12   ;;  %s570_s11 = sphi %s604_s11, %s818_s11   ;;  %s566_s10 = sphi %s602_s10, %s817_s10   ;;  %s562_s9 = sphi %s600_s9, %s816_s9  }
   0x7   : > { %p39_p0 = scmp.ne.s32.totalorder %s566_s10, %s562_s9  ;;  %p800_p1 = scmp.eq.s32.totalorder %s621_s13, 0 }
   0x8   : > { %p90_p3 = scmp.eq.s32.totalorder %s353_s14, 1  ;;  %p354_p5 = scmp.ge.s32.totalorder %s574_s12, 1 }
   0x9   : > { %p630_p4 = por %p800_p1, %p39_p0  ;;  %p97_p7 = scmp.lt.s32.totalorder %s574_s12, 3 }
   0xa   : > { %p635_p6 = por %p90_p3, %p39_p0  ;;  %s576_s18 = smov [#allocation5]  }
   0xb   : > { %s803_s15 = scalar_select %p630_p4, 1, 0 }
   0xc   : > { %s804_s16 = scalar_select %p635_p6, 1, 0 }
   0xd   : > { %p640_p8 = pnand %p354_p5, %p97_p7  ;;  %s109_s19 = sshll.u32 %s576_s18, 4  ;;  %s644_s19 = int_to_ptr.vmem [resolvable:$true] %s109_s19 }
   0xe   : > { %s656_s21 = sadd.s32 1, %s574_s12   ;;  %s26_s22 = sadd.s32 1, %s570_s11 }
   0xf   : > { %s805_s17 = scalar_select %p640_p8, 1, 0 }
  0x10   : > { %p389_p9 = pneg %p640_p8  ;;  %s23_s23 = ssub.s32 %s574_s12, %s656_s21 }
  0x11   : > { %s446_s26 = scalar_lea.hbm %s798_s1, 192 }
  0x12   : > { %p651_p11 = pnand %p389_p9, %p800_p1  ;;  %p447_p12 = scmp.ne.s32.totalorder %s798_s1, %s446_s26 }
  0x13   : > { %p453_p5 = scmp.lt.u32.totalorder %s446_s26, %s798_s1 }
  0x14   : > { %p448_p13 = pneg %p651_p11 }
  0x16   : > { %p449_p0 = pnand %p448_p13, %p447_p12 }
  0x18   : > { %p450_p3 = pneg %p449_p0 }
  0x1a   : > { %p455_p7 = pnand %p453_p5, %p450_p3 }
  0x1c   : > { %458 = shalt.err (!%p455_p7)
}
  0x1d   : > { %s459_s3 = scalar_lea.vmem %s644_s19, 192  ;;  %p467_p2 = scmp.lt.s32.totalorder %s644_s19, %s644_s19 }
  0x1e   : > { %p460_p9 = scmp.ne.s32.totalorder %s644_s19, %s459_s3  ;;  %p468_p6 = scmp.lt.s32.totalorder %s459_s3, %s459_s3 }
  0x20   : > { %p462_p10 = pnand %p460_p9, %p448_p13  ;;  %p469_p4 = por %p468_p6, %p467_p2 }
  0x22   : > { %p463_p1 = pneg %p462_p10 }
  0x24   : > { %p470_p8 = pnand %p469_p4, %p463_p1 }
  0x26   : > { %473 = shalt.err (!%p470_p8)
}
  0x27   : > { %s577_s4 = smov 64   ;;  %s578_s5 = smov 4  }
  0x28   : > { %392 = dma.hbm_to_vmem [thread:$0]  (!%p651_p11), %s798_s1, 192, %s644_s19, [#allocation6], %s577_s4, %s577_s4, %s578_s5  }
  0x29   : > { %p24_p2 = scmp.eq.s32.totalorder %s23_s23, 0  ;;  %p33_p1 = scmp.ne.s32.totalorder %s570_s11, %s566_s10 }
  0x2a   : > { %p34_p4 = scmp.eq.s32.totalorder %s574_s12, 0  ;;  %p402_p6 = scmp.lt.s32.totalorder %s574_s12, 2 }
  0x2b   : > { %s687_s8 = scalar_select %p24_p2, %s570_s11, %s26_s22  }
  0x2c   : > { %p35_p8 = por %p34_p4, %p33_p1  ;;  %p807_p10 = scmp.eq.s32.totalorder %s621_s13, 1 }
  0x2d   : > { %s123_s18 = sand.u32 1, %s570_s11   ;;  %s358_s24 = sshll.u32 %s574_s12, 7 }
  0x2e   : > { %p691_p12 = por %p807_p10, %p33_p1  ;;  %s357_s25 = sshll.u32 %s123_s18, 3 }
  0x2f   : > { %s700_s27 = scalar_lea.hbm %s797_s0, %s358_s24  ;;  %s127_s19 = scalar_lea.vmem [#allocation2], %s357_s25 }
  0x30   : > { %s134_s22 = sshll.u32 %s127_s19, 4  ;;  %p702_p11 = pnand %p402_p6, %p35_p8  ;;  %s706_s22 = int_to_ptr.vmem [resolvable:$true] %s134_s22 }
  0x31   : > { %s124_s28 = scalar_lea.sflag [#allocation3], %s123_s18  ;;  %s474_s29 = scalar_lea.hbm %s700_s27, 128 }
  0x32   : > { %p475_p13 = scmp.ne.s32.totalorder %s700_s27, %s474_s29  ;;  %p476_p0 = pneg %p702_p11 }
  0x33   : > { %s479_s4 = scalar_lea.hbm %s797_s0, 256  ;;  %p480_p7 = scmp.lt.u32.totalorder %s700_s27, %s797_s0 }
  0x34   : > { %p477_p3 = pnand %p476_p0, %p475_p13  ;;  %p481_p9 = scmp.lt.u32.totalorder %s479_s4, %s474_s29 }
  0x35   : > { %p483_p1 = scmp.lt.u32.totalorder %s474_s29, %s700_s27 }
  0x36   : > { %p478_p5 = pneg %p477_p3  ;;  %p482_p2 = por %p481_p9, %p480_p7 }
  0x38   : > { %p484_p4 = por %p483_p1, %p482_p2 }
  0x3a   : > { %p485_p6 = pnand %p484_p4, %p478_p5 }
  0x3c   : > { %488 = shalt.err (!%p485_p6)
}
  0x3d   : > { %s489_s7 = scalar_lea.vmem %s706_s22, 128  ;;  %s579_s18 = smov [#allocation2]  }
  0x3e   : > { %p490_p8 = scmp.ne.s32.totalorder %s706_s22, %s489_s7  ;;  %s494_s24 = sshll.u32 %s579_s18, 4  ;;  %s495_s24 = int_to_ptr.vmem [resolvable:$false] %s494_s24 }
  0x3f   : > { %s496_s25 = scalar_lea.vmem %s495_s24, 256  ;;  %p497_p3 = scmp.lt.s32.totalorder %s706_s22, %s495_s24 }
  0x40   : > { %p492_p10 = pnand %p490_p8, %p476_p0  ;;  %p498_p7 = scmp.lt.s32.totalorder %s496_s25, %s489_s7 }
  0x42   : > { %p493_p13 = pneg %p492_p10  ;;  %p499_p9 = por %p498_p7, %p497_p3 }
  0x44   : > { %p500_p2 = pnand %p499_p9, %p493_p13 }
  0x46   : > { %503 = shalt.err (!%p500_p2)
}
  0x47   : > { %396 = dma.hbm_to_vmem [thread:$0]  (!%p702_p11), %s700_s27, 128, %s706_s22, %s124_s28  }
  0x48   : > { %p810_p5 = scmp.ne.s32.totalorder %s805_s17, 0 }
  0x49   : > { %s736_s20 = sand.u32 (!%p810_p5), 1, %s566_s10   ;;  %p811_p0 = scmp.ne.s32.totalorder (!%p810_p5), %s803_s15, 0 }
  0x4a   : > { %143 = sbr.rel (%p810_p5) target bundleno = 437 (0x1b5), region = 28  ;;  %s360_s26 = sshll.u32 (!%p810_p5), %s736_s20, 3 }
  0x4b   : > { %s146_s19 = scalar_lea.sflag (!%p810_p5), [#allocation3], %s736_s20  ;;  %s149_s29 = scalar_lea.vmem (!%p810_p5), [#allocation2], %s360_s26 }
  0x51   : > { %549 = dma.done.wait (%p811_p0), %s146_s19, 128  }
  0x52   : > { %551 = vsyncadd (%p811_p0), %s146_s19, 4294967168  ;;  %p812_p1 = scmp.eq.s32.totalorder %s621_s13, 0 }
  0x54   : > { %553 = dma.done.wait (%p812_p1), [#allocation6], 192   ;;  %p813_p11 = pmov %p812_p1 }
  0x55   : > { %v580_v0 = vmov 0.0   ;;  %vm581_vm0 = vmmov 0   ;;  %v175_v1 = vld [vmem:[%s149_s29] sm:$0xff]  ;;  %s582_s17 = smov 8   ;;  %v444_v3 = vld [vmem:[#allocation5] sm:$0xff]   ;;  %vm213_vm1 = vcmask 1043456  }
  0x56   : > { %555 = vsyncadd (%p813_p11), [#allocation6], 4294967104  ;;  %373 = vmatprep.subr.bf16.mxu0 %v580_v0  ;;  %377 = vmatprep.mubr.msk.bf16.mxu0 %vm581_vm0, %v580_v0  ;;  %v181_v2 = vrot.slane %v175_v1, 1  ;;  %v445_v4 = vld [vmem:[#allocation5 + $0x8] ss:$0 sps:$4 sm:$0xff]   ;;  %s583_s15 = smov 16  }
  0x57   : > { %185 = vrot.lane.b32.xlu0 %v175_v1, %s582_s17  ;;  %374 = vmatpush3.bf16.msra.mxu0 %v444_v3  ;;  %v215_v5 = vsel %vm213_vm1, %v445_v4, 0  ;;  %v177_v6 = vrot.slane %v175_v1, 7  ;;  %vm192_vm2 = vcmask 64512   ;;  %vm194_vm3 = vcmask 130048   ;;  %s362_s27 = sshll.u32 %s736_s20, 2  ;;  %s367_s22 = sshll.u32 %s621_s13, 6 }
  0x58   : > { %375 = vmatprep.subr.bf16.mxu0 %v580_v0  ;;  %vm209_vm4 = vcmask 195584   ;;  %s173_s23 = scalar_lea.vmem [#allocation7], %s362_s27  ;;  %s753_s4 = scalar_lea.hbm %s799_s2, %s367_s22 }
  0x59   : > { %s273_s28 = sshll.u32 %s173_s23, 4  ;;  %s260_s5 = scalar_lea.sflag [#allocation4], %s736_s20  ;;  %s755_s28 = int_to_ptr.vmem [resolvable:$true] %s273_s28 }
  0x5a   : > { %s504_s13 = scalar_lea.vmem %s755_s28, 64  ;;  %s584_s6 = smov [#allocation7]  }
  0x5b   : > { %189 = vrot.lane.b32.xlu0 %v181_v2, %s583_s15  ;;  %376 = vmatpush3.bf16.msra.mxu0 %v215_v5  ;;  %p505_p4 = scmp.ne.s32.totalorder %s755_s28, %s504_s13  ;;  %s508_s7 = sshll.u32 %s584_s6, 4  ;;  %s509_s7 = int_to_ptr.vmem [resolvable:$false] %s508_s7 }
  0x5c   : > { %s510_s18 = scalar_lea.vmem %s509_s7, 128  ;;  %p511_p10 = scmp.lt.s32.totalorder %s755_s28, %s509_s7 }
  0x5d   : > { %p506_p6 = pnand %p505_p4, %p691_p12  ;;  %p512_p13 = scmp.lt.s32.totalorder %s510_s18, %s504_s13 }
  0x5f   : > { %p507_p8 = pneg %p506_p6  ;;  %p513_p3 = por %p512_p13, %p511_p10 }
  0x61   : > { %p514_p7 = pnand %p513_p3, %p507_p8 }
  0xc9   : > { %v186_v7 = vpop.permute.xlu0 %185 }
  0xca   : > { %v193_v8 = vsel %vm192_vm2, %v177_v6, %v186_v7 }
  0xcd   : > { %v190_v9 = vpop.permute.xlu0 %189 }
  0xce   : > { %v195_v10 = vsel %vm194_vm3, %v193_v8, %v190_v9 }
  0xcf   : > { %v196_v11 = vpack.c.bf16 %v195_v10, %v195_v10 }
  0xd1   : > { %378 = vmatmul.mubr.msk.bf16.vlgmr.msra.gmra.mrb[0].mxu0 %vm209_vm4, %v196_v11 }
 0x1a4   : > { %v251_v12 = vpop.f32.mrb[0].mxu0 }
 0x1a5   : > { %v257_v13 = vpack.c.bf16 %v251_v12, %v251_v12  ;;  %v379_v14 = vpop.f32.mrb[1].mxu0 }
 0x1a6   : > { %v254_v15 = vpop.f32.mrb[2].mxu0 }
 0x1a7   : > { %258 = vst [vmem:[%s173_s23] sm:$0xf] %v257_v13  ;;  %v380_v16 = vpop.f32.mrb[3].mxu0 }
 0x1a8   : > { %517 = shalt.err (!%p514_p7)
}
 0x1a9   : > { %s518_s24 = scalar_lea.hbm %s753_s4, 64  ;;  %s522_s26 = scalar_lea.hbm %s799_s2, 128 }
 0x1aa   : > { %p519_p9 = scmp.ne.s32.totalorder %s753_s4, %s518_s24  ;;  %p523_p0 = scmp.lt.u32.totalorder %s753_s4, %s799_s2 }
 0x1ab   : > { %p524_p1 = scmp.lt.u32.totalorder %s522_s26, %s518_s24  ;;  %p526_p4 = scmp.lt.u32.totalorder %s518_s24, %s753_s4 }
 0x1ac   : > { %p520_p2 = pnand %p519_p9, %p691_p12 }
 0x1ad   : > { %p525_p11 = por %p524_p1, %p523_p0 }
 0x1ae   : > { %p521_p5 = pneg %p520_p2 }
 0x1af   : > { %p527_p6 = por %p526_p4, %p525_p11 }
 0x1b1   : > { %p528_p8 = pnand %p527_p6, %p521_p5 }
 0x1b3   : > { %531 = shalt.err (!%p528_p8)
}
 0x1b4   : > { %387 = dma.vmem_to_hbm [thread:$0]  (%p691_p12), %s755_s28, 64, %s753_s4, %s260_s5  }
 0x1b5 PF: > { %s285_s17 = sand.u32 1, %s562_s9   ;;  %p814_p10 = scmp.ne.s32.totalorder %s804_s16, 0 }
 0x1b6   : > { %p815_p13 = scmp.ge.s32.totalorder %s574_s12, 2  ;;  %s286_s15 = scalar_lea.sflag [#allocation4], %s285_s17 }
 0x1b8   : > { %p398_p3 = pnand %p815_p13, %p814_p10 }
 0x1ba   : > { %557 = dma.done.wait (!%p398_p3), %s286_s15, 64  }
 0x1bb   : > { %559 = vsyncadd (!%p398_p3), %s286_s15, 4294967232  ;;  %p16_p7 = scmp.ge.s32.totalorder %s656_s21, 4   ;;  %s816_s9 = smov %s566_s10 }
 0x1bc   : > { %s817_s10 = smov %s570_s11  ;;  %s818_s11 = smov %s687_s8 }
 0x1bd   : > { %s819_s12 = smov %s656_s21  ;;  %18 = sbr.rel (!%p16_p7) target bundleno = 6 (0x6), region = 77 }
 0x1c4   :  { %291 = vsyncpa [#allocation3], 1 }
 0x1c5   :  { %293 = vsyncpa [#allocation3 + $0x1], 1 }
 0x1c6   :  { %294 = vsyncpa [#allocation6], 1 }
 0x1c7   :  { %295 = vsyncpa [#allocation4], 1 }
 0x1c8   :  { %297 = vsyncpa [#allocation4 + $0x1], 1 }

</bundles_post_ra>
